<compile_context>
chip_gen: v5e
topology: v5e:2x2
jax: 0.10.0
libtpu: 0.0.40
codegen_flags: <defaults>
</compile_context>

<pallas_src>
import functools

import jax
import jax.numpy as jnp
from jax.experimental import pallas as pl
from jax.experimental.pallas import tpu as pltpu


def _round_up(x: int, m: int) -> int:
    return ((x + m - 1) // m) * m


def _fused_head_kernel(act_ref, x0t_ref, w1at_ref, tabt_ref, w2t_ref, b2t_ref,
                       out_ref):
    """Fused (embedding-folded) 2-layer MLP head, feature-major layout.

    act_ref : (1, TB)      int32   action ids for this batch tile
    x0t_ref : (F_in, TB)   f32     x0^T tile (cast to bf16 in-kernel)
    w1at_ref: (H, F_in)    bf16    W1[:F,:]^T           (VMEM resident)
    tabt_ref: (H, A)       bf16    (emb @ W1[F:,:] + b1)^T  (VMEM resident)
    w2t_ref : (F_out, H)   bf16    W2^T                 (VMEM resident)
    b2t_ref : (F_out, 1)   f32     b2^T                 (VMEM resident)
    out_ref : (F_out, TB)  f32     out^T tile (lane-dense store)
    """
    acts = act_ref[...]                                        # (1, TB) int32
    num_actions = tabt_ref.shape[1]
    tb = acts.shape[1]

    # Folded embedding lookup as a tiny bf16 one-hot matmul:
    #   act_bias^T = table^T @ onehot^T,  onehot^T : (A, TB)
    iota = jax.lax.broadcasted_iota(jnp.int32, (num_actions, tb), 0)
    onehot_t = jnp.where(iota == acts, 1.0, 0.0).astype(jnp.bfloat16)
    act_bias = jnp.dot(tabt_ref[...], onehot_t,
                       preferred_element_type=jnp.float32)     # (H, TB) f32

    # First linear on the x0 half of the (virtual) concat. bf16 MXU, f32 acc.
    x0_bf = x0t_ref[...].astype(jnp.bfloat16)                  # in-kernel cast
    h = jnp.dot(w1at_ref[...], x0_bf,
                preferred_element_type=jnp.float32) + act_bias  # (H, TB) f32
    h = jnp.maximum(h, 0.0)                                     # ReLU in f32

    # Second linear. bf16 MXU, f32 acc, f32 bias.
    o = jnp.dot(w2t_ref[...], h.astype(jnp.bfloat16),
                preferred_element_type=jnp.float32)             # (F_out, TB)
    out_ref[...] = o + b2t_ref[...]


@functools.partial(jax.jit, static_argnames=("tb_max",))
def forward_model(x0, action, prep, *, tb_max=2048):
    """ForwardModel.forward, fully fused into one Pallas call.

    x0:     (B, feature_dim) float32
    action: (B,) int32
    prep:   output of prepare_params()
    Returns (B, feature_dim) float32.
    """
    B, F_in = x0.shape
    H = prep["w1at"].shape[0]
    F_out = prep["w2t"].shape[0]
    A = prep["act_tablet"].shape[1]

    # Batch lives on the lane axis: pad to a multiple of 128 and pick the
    # largest tile that fits tb_max, limiting pad waste when multiple tiles
    # are needed (also yields grid>=2 for v7x megacore in that regime).
    bp128 = _round_up(B, 128)
    if bp128 <= tb_max:
        TB = bp128
        n_tiles = 1
    else:
        n_tiles = -(-bp128 // tb_max)                    # ceil div
        TB = _round_up(-(-bp128 // n_tiles), 128)
    Bp = n_tiles * TB

    # Layout plumbing only (no compute hoisting): transpose to feature-major
    # and pad the lane (batch) axis.  bf16 cast happens inside the kernel.
    x0t = jnp.pad(x0.T, ((0, 0), (0, Bp - B)))                    # (F_in, Bp)
    actt = jnp.pad(action.astype(jnp.int32).reshape(1, -1),
                   ((0, 0), (0, Bp - B)))                         # (1, Bp)

    grid = (n_tiles,)

    flops = 2 * Bp * (F_in * H + A * H + H * F_out)
    bytes_accessed = (actt.size * 4 + x0t.size * 4 +
                      prep["w1at"].size * 2 + prep["act_tablet"].size * 2 +
                      prep["w2t"].size * 2 + prep["b2t"].size * 4 +
                      Bp * F_out * 4)

    out_t = pl.pallas_call(
        _fused_head_kernel,
        out_shape=jax.ShapeDtypeStruct((F_out, Bp), jnp.float32),
        grid_spec=pltpu.PrefetchScalarGridSpec(
            num_scalar_prefetch=0,
            grid=grid,
            in_specs=[
                pl.BlockSpec((1, TB), lambda i: (0, i)),       # action ids row
                pl.BlockSpec((F_in, TB), lambda i: (0, i)),    # x0^T tile
                pl.BlockSpec((H, F_in), lambda i: (0, 0)),     # W1a^T  (bf16)
                pl.BlockSpec((H, A), lambda i: (0, 0)),        # table^T (bf16)
                pl.BlockSpec((F_out, H), lambda i: (0, 0)),    # W2^T   (bf16)
                pl.BlockSpec((F_out, 1), lambda i: (0, 0)),    # b2^T   (f32)
            ],
            out_specs=pl.BlockSpec((F_out, TB), lambda i: (0, i)),
        ),
        compiler_params=pltpu.CompilerParams(
            dimension_semantics=("parallel",)),
        cost_estimate=pl.CostEstimate(
            flops=flops, transcendentals=0, bytes_accessed=bytes_accessed),
    )(actt, x0t, prep["w1at"], prep["act_tablet"], prep["w2t"], prep["b2t"])

    return out_t[:, :B].T


def prepare_params(params):
    """One-time prep: fold embedding + b1 into a per-action table, transpose
    everything to the feature-major kernel layout, and cast matmul operands
    to bf16."""
    emb = params["embedding"]               # (A, F//2) f32
    w1 = params["w1"]                       # (F + F//2, H) f32
    b1 = params["b1"]                       # (1, H) f32
    w2 = params["w2"]                       # (H, F) f32
    b2 = params["b2"]                       # (1, F) f32
    feature_dim = w2.shape[1]

    w1a = w1[:feature_dim, :]               # rows acting on x0        (F, H)
    w1b = w1[feature_dim:, :]               # rows acting on act emb   (F//2, H)
    # (A, H): folds Embedding lookup + concat + first-layer bias.
    act_table = emb @ w1b + b1

    return {
        "w1at": jnp.asarray(w1a.T, dtype=jnp.bfloat16),           # (H, F)
        "act_tablet": jnp.asarray(act_table.T, dtype=jnp.bfloat16),  # (H, A)
        "w2t": jnp.asarray(w2.T, dtype=jnp.bfloat16),             # (F, H)
        "b2t": jnp.asarray(b2.T, dtype=jnp.float32),              # (F, 1)
    }


def init_params(key, action_dim, feature_dim, hidden=256):
    action_features = feature_dim // 2
    d_in = feature_dim + action_features
    k = jax.random.split(key, 5)
    emb = jax.random.normal(k[0], (action_dim, action_features), jnp.float32)
    lim1 = 1.0 / jnp.sqrt(d_in)
    w1 = jax.random.uniform(k[1], (d_in, hidden), jnp.float32, -lim1, lim1)
    b1 = jax.random.uniform(k[2], (1, hidden), jnp.float32, -lim1, lim1)
    lim2 = 1.0 / jnp.sqrt(hidden)
    w2 = jax.random.uniform(k[3], (hidden, feature_dim), jnp.float32, -lim2, lim2)
    b2 = jax.random.uniform(k[4], (1, feature_dim), jnp.float32, -lim2, lim2)
    return {"embedding": emb, "w1": w1, "b1": b1, "w2": w2, "b2": b2}


if __name__ == "__main__":
    ACTION_DIM = 4
    FEATURE_DIM = 32
    BATCH = 8

    key = jax.random.PRNGKey(0)
    pkey, xkey, akey = jax.random.split(key, 3)
    params = init_params(pkey, ACTION_DIM, FEATURE_DIM)
    prep = prepare_params(params)

    x0 = jax.random.normal(xkey, (BATCH, FEATURE_DIM), jnp.float32)
    action = jax.random.randint(akey, (BATCH,), 0, ACTION_DIM)

    out = forward_model(x0, action, prep)
    out = jax.block_until_ready(out)
    assert out.shape == (BATCH, FEATURE_DIM)

    # Reference 1: same mixed-precision recipe in plain JAX (tight check of
    # the kernel itself: one-hot fold, transposed layout, bias handling).
    onehot = jax.nn.one_hot(action, ACTION_DIM, dtype=jnp.bfloat16)
    act_bias = jnp.dot(onehot, prep["act_tablet"].T,
                       preferred_element_type=jnp.float32)
    h1 = jnp.maximum(
        jnp.dot(x0.astype(jnp.bfloat16), prep["w1at"].T,
                preferred_element_type=jnp.float32) + act_bias, 0.0)
    ref_mixed = jnp.dot(h1.astype(jnp.bfloat16), prep["w2t"].T,
                        preferred_element_type=jnp.float32) + prep["b2t"].T
    assert jnp.allclose(out, ref_mixed, atol=3e-3, rtol=3e-3)

    # Reference 2: full-f32 PyTorch semantics (loose check; bf16 weights /
    # fold table only perturb numerics slightly).
    act_feat = jnp.take(params["embedding"], action, axis=0)
    z = jnp.concatenate([x0, act_feat], axis=-1)
    h = jnp.maximum(z @ params["w1"] + params["b1"], 0.0)
    ref_f32 = h @ params["w2"] + params["b2"]
    assert jnp.allclose(out, ref_f32, atol=5e-2, rtol=5e-2)

    print("KERNEL_OK")
</pallas_src>

<mosaic_0001>
module attributes {stable_mosaic.version = 11 : i64} {
  func.func @_fused_head_kernel(%arg0: i32, %arg1: memref<1x128xi32, #tpu.memory_space<vmem>>, %arg2: memref<32x128xf32, #tpu.memory_space<vmem>>, %arg3: memref<256x32xbf16, #tpu.memory_space<vmem>>, %arg4: memref<256x4xbf16, #tpu.memory_space<vmem>>, %arg5: memref<32x256xbf16, #tpu.memory_space<vmem>>, %arg6: memref<32x1xf32, #tpu.memory_space<vmem>>, %arg7: memref<32x128xf32, #tpu.memory_space<vmem>>) attributes {dimension_semantics = [#tpu.dimension_semantics<parallel>], iteration_bounds = array<i64: 1>, scalar_prefetch = 0 : i64, scratch_operands = 0 : i64, tpu.core_type = #tpu.core_type<tc>, window_params = [{transform_indices = @transform_0, window_bounds = array<i64: 1, 128>}, {transform_indices = @transform_1, window_bounds = array<i64: 32, 128>}, {pipeline_mode = #tpu.pipeline_mode<synchronous>, transform_indices = @transform_2, window_bounds = array<i64: 256, 32>}, {pipeline_mode = #tpu.pipeline_mode<synchronous>, transform_indices = @transform_3, window_bounds = array<i64: 256, 4>}, {pipeline_mode = #tpu.pipeline_mode<synchronous>, transform_indices = @transform_4, window_bounds = array<i64: 32, 256>}, {pipeline_mode = #tpu.pipeline_mode<synchronous>, transform_indices = @transform_5, window_bounds = array<i64: 32, 1>}, {transform_indices = @transform_6, window_bounds = array<i64: 32, 128>}]} {
    %c0 = arith.constant 0 : index
    %c0_0 = arith.constant 0 : index
    %0 = vector.load %arg1[%c0, %c0_0] : memref<1x128xi32, #tpu.memory_space<vmem>>, vector<1x128xi32>
    %1 = tpu.iota {dimensions = array<i32: 0>} : vector<4x128xi32>
    %2 = vector.broadcast %0 : vector<1x128xi32> to vector<4x128xi32>
    %3 = arith.cmpi eq, %1, %2 : vector<4x128xi32>
    %cst = arith.constant 1.000000e+00 : f32
    %cst_1 = arith.constant 0.000000e+00 : f32
    %4 = vector.broadcast %cst : f32 to vector<4x128xf32>
    %5 = vector.broadcast %cst_1 : f32 to vector<4x128xf32>
    %6 = arith.select %3, %4, %5 : vector<4x128xi1>, vector<4x128xf32>
    %7 = arith.truncf %6 : vector<4x128xf32> to vector<4x128xbf16>
    %c0_2 = arith.constant 0 : index
    %c0_3 = arith.constant 0 : index
    %8 = vector.load %arg4[%c0_2, %c0_3] : memref<256x4xbf16, #tpu.memory_space<vmem>>, vector<256x4xbf16>
    %cst_4 = arith.constant dense<0.000000e+00> : vector<256x128xf32>
    %9 = tpu.matmul %8, %7, %cst_4 {dimension_numbers = #tpu.dot_dimension_numbers<[1], [0], [0], [1], [0, 0, 1, 1], [], []>} : vector<256x4xbf16>, vector<4x128xbf16>, vector<256x128xf32> -> vector<256x128xf32>
    %c0_5 = arith.constant 0 : index
    %c0_6 = arith.constant 0 : index
    %10 = vector.load %arg2[%c0_5, %c0_6] : memref<32x128xf32, #tpu.memory_space<vmem>>, vector<32x128xf32>
    %11 = arith.truncf %10 : vector<32x128xf32> to vector<32x128xbf16>
    %c0_7 = arith.constant 0 : index
    %c0_8 = arith.constant 0 : index
    %12 = vector.load %arg3[%c0_7, %c0_8] : memref<256x32xbf16, #tpu.memory_space<vmem>>, vector<256x32xbf16>
    %cst_9 = arith.constant dense<0.000000e+00> : vector<256x128xf32>
    %13 = tpu.matmul %12, %11, %cst_9 {dimension_numbers = #tpu.dot_dimension_numbers<[1], [0], [0], [1], [0, 0, 1, 1], [], []>} : vector<256x32xbf16>, vector<32x128xbf16>, vector<256x128xf32> -> vector<256x128xf32>
    %14 = arith.addf %13, %9 : vector<256x128xf32>
    %cst_10 = arith.constant 0.000000e+00 : f32
    %15 = vector.broadcast %cst_10 : f32 to vector<256x128xf32>
    %16 = arith.maximumf %14, %15 : vector<256x128xf32>
    %c0_11 = arith.constant 0 : index
    %c0_12 = arith.constant 0 : index
    %17 = vector.load %arg5[%c0_11, %c0_12] : memref<32x256xbf16, #tpu.memory_space<vmem>>, vector<32x256xbf16>
    %18 = arith.truncf %16 : vector<256x128xf32> to vector<256x128xbf16>
    %cst_13 = arith.constant dense<0.000000e+00> : vector<32x128xf32>
    %19 = tpu.matmul %17, %18, %cst_13 {dimension_numbers = #tpu.dot_dimension_numbers<[1], [0], [0], [1], [0, 0, 1, 1], [], []>} : vector<32x256xbf16>, vector<256x128xbf16>, vector<32x128xf32> -> vector<32x128xf32>
    %c0_14 = arith.constant 0 : index
    %c0_15 = arith.constant 0 : index
    %20 = vector.load %arg6[%c0_14, %c0_15] : memref<32x1xf32, #tpu.memory_space<vmem>>, vector<32x1xf32>
    %21 = vector.broadcast %20 : vector<32x1xf32> to vector<32x128xf32>
    %22 = arith.addf %19, %21 : vector<32x128xf32>
    %c0_16 = arith.constant 0 : index
    %c0_17 = arith.constant 0 : index
    %23 = vector.load %arg7[%c0_16, %c0_17] : memref<32x128xf32, #tpu.memory_space<vmem>>, vector<32x128xf32>
    tpu.vector_store %arg7[%c0_16, %c0_17], %22 {strides = array<i32>} : memref<32x128xf32, #tpu.memory_space<vmem>>, vector<32x128xf32>,
    return
  }
  func.func @transform_0(%arg0: i32) -> (i32, i32) {
    %c0_i32 = arith.constant 0 : i32
    %c0_i32_0 = arith.constant 0 : i32
    return %c0_i32, %arg0 : i32, i32
  }
  func.func @transform_1(%arg0: i32) -> (i32, i32) {
    %c0_i32 = arith.constant 0 : i32
    %c0_i32_0 = arith.constant 0 : i32
    return %c0_i32, %arg0 : i32, i32
  }
  func.func @transform_2(%arg0: i32) -> (i32, i32) {
    %c0_i32 = arith.constant 0 : i32
    %c0_i32_0 = arith.constant 0 : i32
    %c0_i32_1 = arith.constant 0 : i32
    return %c0_i32, %c0_i32_0 : i32, i32
  }
  func.func @transform_3(%arg0: i32) -> (i32, i32) {
    %c0_i32 = arith.constant 0 : i32
    %c0_i32_0 = arith.constant 0 : i32
    %c0_i32_1 = arith.constant 0 : i32
    return %c0_i32, %c0_i32_0 : i32, i32
  }
  func.func @transform_4(%arg0: i32) -> (i32, i32) {
    %c0_i32 = arith.constant 0 : i32
    %c0_i32_0 = arith.constant 0 : i32
    %c0_i32_1 = arith.constant 0 : i32
    return %c0_i32, %c0_i32_0 : i32, i32
  }
  func.func @transform_5(%arg0: i32) -> (i32, i32) {
    %c0_i32 = arith.constant 0 : i32
    %c0_i32_0 = arith.constant 0 : i32
    %c0_i32_1 = arith.constant 0 : i32
    return %c0_i32, %c0_i32_0 : i32, i32
  }
  func.func @transform_6(%arg0: i32) -> (i32, i32) {
    %c0_i32 = arith.constant 0 : i32
    %c0_i32_0 = arith.constant 0 : i32
    return %c0_i32, %arg0 : i32, i32
  }
}

</mosaic_0001>

<bundles_post_ra>
// kernel: forward_model.1
= control target key start
LH: loop header
LB: loop body
LE: loop exit
PB: predicated region body
PF: predicated region fallthrough
CT: control target
= control target key end

     0   :  { %v25_v0 = vlaneseq  ;;  %v903_v9 = vmov 0.0   ;;  %vm192_vm1 = vcmask 1041408   ;;  %vm403_vm2 = vcmask 261120   ;;  %s1155_s1 = inlined_call_operand.vmem [shape: f32[32,128], index: 1, kind: input, shape index: {}]   ;;  %s1156_s0 = inlined_call_operand.vmem [shape: s32[1,128], index: 0, kind: input, shape index: {}]   ;;  %s1157_s2 = inlined_call_operand.vmem [shape: bf16[256,32], index: 2, kind: input, shape index: {}]   ;;  %s1158_s3 = inlined_call_operand.vmem [shape: bf16[256,4], index: 3, kind: input, shape index: {}]   ;;  %s1159_s5 = inlined_call_operand.vmem [shape: f32[32,1], index: 5, kind: input, shape index: {}]   ;;  %s1160_s4 = inlined_call_operand.vmem [shape: bf16[32,256], index: 4, kind: input, shape index: {}]   ;;  %s1161_s6 = inlined_call_operand.vmem [shape: f32[32,128], index: 6, kind: output, shape index: {}]  }
   0x1   :  { %v287_v1 = vld [vmem:[%s1155_s1 + $0x10] sm:$0xff]  ;;  %v288_v2 = vld [vmem:[%s1155_s1 + $0x18] sm:$0xff]  ;;  %v285_v3 = vld [vmem:[%s1155_s1] sm:$0xff]  ;;  %vm143_vm3 = vcmask 31744  }
   0x2   :  { %v290_v4 = vpack.c.bf16 %v288_v2, %v287_v1  ;;  %v286_v5 = vld [vmem:[%s1155_s1 + $0x8] sm:$0xff]  ;;  %v26_v6 = vshrl.u32 %v25_v0, 7  ;;  %v902_v7 = vld [vmem:[%s1156_s0] ss:$0 sm:$0xff]  ;;  %v885_v13 = vld [vmem:[%s1157_s2 + $0x50] sm:$0xff] }
   0x3   :  { %v289_v8 = vpack.c.bf16 %v286_v5, %v285_v3  ;;  %v875_v12 = vld [vmem:[%s1157_s2] sm:$0xff]  ;;  %v869_v16 = vld [vmem:[%s1158_s3 + $0x50] sm:$0xff]  ;;  %v876_v17 = vld [vmem:[%s1157_s2 + $0x8] sm:$0xff] }
   0x4   :  { %458 = vmatpush.bf16.msra.mxu1 %v290_v4  ;;  %896 = vmatpush.bf16.msra.mxu2 %v290_v4  ;;  %vm28_vm0 = vcmp.eq.s32.totalorder %v26_v6, %v902_v7  ;;  %v859_v15 = vld [vmem:[%s1158_s3] sm:$0xff]  ;;  %v886_v18 = vld [vmem:[%s1157_s2 + $0x58] sm:$0xff]  ;;  %v860_v19 = vld [vmem:[%s1158_s3 + $0x8] sm:$0xff] }
   0x5   :  { %v29_v10 = vsel %vm28_vm0, 1.0, %v903_v9  ;;  %v870_v20 = vld [vmem:[%s1158_s3 + $0x58] sm:$0xff]  ;;  %v877_v21 = vld [vmem:[%s1157_s2 + $0x10] sm:$0xff]  ;;  %v887_v22 = vld [vmem:[%s1157_s2 + $0x60] sm:$0xff] }
   0x6   :  { %v30_v11 = vpack.c.bf16 %v29_v10, %v29_v10  ;;  %v861_v23 = vld [vmem:[%s1158_s3 + $0x10] sm:$0xff]  ;;  %v871_v24 = vld [vmem:[%s1158_s3 + $0x60] sm:$0xff]  ;;  %v878_v25 = vld [vmem:[%s1157_s2 + $0x18] sm:$0xff] }
   0x7   :  { %v888_v26 = vld [vmem:[%s1157_s2 + $0x68] sm:$0xff]  ;;  %v862_v27 = vld [vmem:[%s1158_s3 + $0x18] sm:$0xff]  ;;  %v879_v29 = vld [vmem:[%s1157_s2 + $0x20] sm:$0xff] }
   0x8   :  { %459 = vmatpush.bf16.msra.mxu1 %v289_v8  ;;  %v194_v14 = vsel %vm192_vm1, %v30_v11, 0  ;;  %897 = vmatpush.bf16.msra.mxu2 %v289_v8  ;;  %v872_v28 = vld [vmem:[%s1158_s3 + $0x68] sm:$0xff]  ;;  %v889_v30 = vld [vmem:[%s1157_s2 + $0x70] sm:$0xff]  ;;  %v863_v31 = vld [vmem:[%s1158_s3 + $0x20] sm:$0xff] }
   0x9   :  { %203 = vmatpush.bf16.msra.mxu0 %v194_v14  ;;  %895 = vmatpush.bf16.msra.mxu3 %v194_v14  ;;  %v873_v32 = vld [vmem:[%s1158_s3 + $0x70] sm:$0xff]  ;;  %v880_v33 = vld [vmem:[%s1157_s2 + $0x28] sm:$0xff]  ;;  %v890_v34 = vld [vmem:[%s1157_s2 + $0x78] sm:$0xff] }
   0xa   :  { %v864_v35 = vld [vmem:[%s1158_s3 + $0x28] sm:$0xff]  ;;  %v874_v36 = vld [vmem:[%s1158_s3 + $0x78] sm:$0xff]  ;;  %v881_v37 = vld [vmem:[%s1157_s2 + $0x30] sm:$0xff] }
   0xb   :  { %827 = vmatmul.msk.bf16.vlgmr.msra.gmra.mxu1 %vm403_vm2, %v875_v12  ;;  %837 = vmatmul.msk.bf16.vlgmr.msra.gmra.mxu2 %vm403_vm2, %v885_v13  ;;  %v865_v38 = vld [vmem:[%s1158_s3 + $0x30] sm:$0xff]  ;;  %v882_v39 = vld [vmem:[%s1157_s2 + $0x38] sm:$0xff]  ;;  %v883_v41 = vld [vmem:[%s1157_s2 + $0x40] sm:$0xff] }
   0xc   :  { %747 = vmatmul.msk.bf16.vlgmr.msra.gmra.mxu0 %vm143_vm3, %v859_v15  ;;  %757 = vmatmul.msk.bf16.vlgmr.msra.gmra.mxu3 %vm143_vm3, %v869_v16  ;;  %v866_v40 = vld [vmem:[%s1158_s3 + $0x38] sm:$0xff]  ;;  %v867_v43 = vld [vmem:[%s1158_s3 + $0x40] sm:$0xff]  ;;  %v884_v57 = vld [vmem:[%s1157_s2 + $0x48] sm:$0xff] }
   0xd   :  { %v868_v61 = vld [vmem:[%s1158_s3 + $0x48] sm:$0xff] }
  0x1b   :  { %828 = vmatmul.msk.bf16.gmra.mxu1 %vm403_vm2, %v876_v17  ;;  %838 = vmatmul.msk.bf16.gmra.mxu2 %vm403_vm2, %v886_v18 }
  0x1c   :  { %748 = vmatmul.msk.bf16.gmra.mxu0 %vm143_vm3, %v860_v19  ;;  %758 = vmatmul.msk.bf16.gmra.mxu3 %vm143_vm3, %v870_v20 }
  0x2b   :  { %829 = vmatmul.msk.bf16.gmra.mxu1 %vm403_vm2, %v877_v21  ;;  %839 = vmatmul.msk.bf16.gmra.mxu2 %vm403_vm2, %v887_v22 }
  0x2c   :  { %749 = vmatmul.msk.bf16.gmra.mxu0 %vm143_vm3, %v861_v23  ;;  %759 = vmatmul.msk.bf16.gmra.mxu3 %vm143_vm3, %v871_v24 }
  0x3b   :  { %830 = vmatmul.msk.bf16.gmra.mxu1 %vm403_vm2, %v878_v25  ;;  %840 = vmatmul.msk.bf16.gmra.mxu2 %vm403_vm2, %v888_v26 }
  0x3c   :  { %750 = vmatmul.msk.bf16.gmra.mxu0 %vm143_vm3, %v862_v27  ;;  %760 = vmatmul.msk.bf16.gmra.mxu3 %vm143_vm3, %v872_v28 }
  0x4b   :  { %831 = vmatmul.msk.bf16.gmra.mxu1 %vm403_vm2, %v879_v29  ;;  %841 = vmatmul.msk.bf16.gmra.mxu2 %vm403_vm2, %v889_v30 }
  0x4c   :  { %751 = vmatmul.msk.bf16.gmra.mxu0 %vm143_vm3, %v863_v31  ;;  %761 = vmatmul.msk.bf16.gmra.mxu3 %vm143_vm3, %v873_v32 }
  0x5b   :  { %832 = vmatmul.msk.bf16.gmra.mxu1 %vm403_vm2, %v880_v33  ;;  %842 = vmatmul.msk.bf16.gmra.mxu2 %vm403_vm2, %v890_v34 }
  0x5c   :  { %752 = vmatmul.msk.bf16.gmra.mxu0 %vm143_vm3, %v864_v35  ;;  %762 = vmatmul.msk.bf16.gmra.mxu3 %vm143_vm3, %v874_v36 }
  0x6b   :  { %833 = vmatmul.msk.bf16.gmra.mxu1 %vm403_vm2, %v881_v37 }
  0x6c   :  { %753 = vmatmul.msk.bf16.gmra.mxu0 %vm143_vm3, %v865_v38 }
  0x7b   :  { %834 = vmatmul.msk.bf16.gmra.mxu1 %vm403_vm2, %v882_v39 }
  0x7c   :  { %754 = vmatmul.msk.bf16.gmra.mxu0 %vm143_vm3, %v866_v40 }
  0x88   :  { %v461_v42 = vpop.f32.mrf.mxu1 }
  0x89   :  { %v205_v44 = vpop.f32.mrf.mxu0 }
  0x8a   :  { %v462_v45 = vadd.f32 %v461_v42, %v205_v44 }
  0x8b   :  { %835 = vmatmul.msk.bf16.gmra.mxu1 %vm403_vm2, %v883_v41 }
  0x8c   :  { %755 = vmatmul.msk.bf16.gmra.mxu0 %vm143_vm3, %v867_v43  ;;  %v541_v52 = vmax.f32 %v462_v45, 0.0 }
  0x8e   :  { %v511_v46 = vpop.f32.mrf.mxu2 }
  0x8f   :  { %v255_v47 = vpop.f32.mrf.mxu3 }
  0x90   :  { %v512_v48 = vadd.f32 %v511_v46, %v255_v47  ;;  %v463_v49 = vpop.f32.mrf.mxu1 }
  0x91   :  { %v207_v50 = vpop.f32.mrf.mxu0 }
  0x92   :  { %v464_v51 = vadd.f32 %v463_v49, %v207_v50  ;;  %v561_v58 = vmax.f32 %v512_v48, 0.0 }
  0x94   :  { %v542_v53 = vmax.f32 %v464_v51, 0.0 }
  0x96   :  { %v513_v54 = vpop.f32.mrf.mxu2  ;;  %v1075_v55 = vpack.c.bf16 %v542_v53, %v541_v52 }
  0x97   :  { %v257_v56 = vpop.f32.mrf.mxu3 }
  0x98   :  { %v514_v59 = vadd.f32 %v513_v54, %v257_v56  ;;  %v466_v60 = vpop.f32.mrf.mxu1 }
  0x99   :  { %v210_v62 = vpop.f32.mrf.mxu0 }
  0x9a   :  { %v562_v63 = vmax.f32 %v514_v59, 0.0  ;;  %v467_v0 = vadd.f32 %v466_v60, %v210_v62 }
  0x9b   :  { %836 = vmatmul.msk.bf16.gmra.mxu1 %vm403_vm2, %v884_v57 }
  0x9c   :  { %756 = vmatmul.msk.bf16.gmra.mxu0 %vm143_vm3, %v868_v61  ;;  %v1085_v1 = vpack.c.bf16 %v562_v63, %v561_v58  ;;  %v543_v8 = vmax.f32 %v467_v0, 0.0 }
  0x9e   :  { %v516_v2 = vpop.f32.mrf.mxu2 }
  0x9f   :  { %v260_v3 = vpop.f32.mrf.mxu3 }
  0xa0   :  { %v517_v4 = vadd.f32 %v516_v2, %v260_v3  ;;  %v468_v5 = vpop.f32.mrf.mxu1 }
  0xa1   :  { %v212_v6 = vpop.f32.mrf.mxu0 }
  0xa2   :  { %v469_v7 = vadd.f32 %v468_v5, %v212_v6  ;;  %v563_v13 = vmax.f32 %v517_v4, 0.0 }
  0xa4   :  { %v544_v9 = vmax.f32 %v469_v7, 0.0 }
  0xa6   :  { %v518_v10 = vpop.f32.mrf.mxu2  ;;  %v1087_v11 = vpack.c.bf16 %v544_v9, %v543_v8 }
  0xa7   :  { %v262_v12 = vpop.f32.mrf.mxu3 }
  0xa8   :  { %v519_v14 = vadd.f32 %v518_v10, %v262_v12  ;;  %v471_v15 = vpop.f32.mrf.mxu1 }
  0xa9   :  { %v215_v16 = vpop.f32.mrf.mxu0 }
  0xaa   :  { %v564_v17 = vmax.f32 %v519_v14, 0.0  ;;  %v472_v18 = vadd.f32 %v471_v15, %v215_v16 }
  0xac   :  { %v1089_v19 = vpack.c.bf16 %v564_v17, %v563_v13  ;;  %v545_v26 = vmax.f32 %v472_v18, 0.0 }
  0xae   :  { %v521_v20 = vpop.f32.mrf.mxu2 }
  0xaf   :  { %v265_v21 = vpop.f32.mrf.mxu3 }
  0xb0   :  { %v1091_v22 = vadd.f32 %v521_v20, %v265_v21  ;;  %v473_v23 = vpop.f32.mrf.mxu1 }
  0xb1   :  { %v217_v24 = vpop.f32.mrf.mxu0 }
  0xb2   :  { %v474_v25 = vadd.f32 %v473_v23, %v217_v24  ;;  %v565_v20 = vmax.f32 %v1091_v22, 0.0 }
  0xb4   :  { %v546_v27 = vmax.f32 %v474_v25, 0.0 }
  0xb6   :  { %v523_v28 = vpop.f32.mrf.mxu2  ;;  %v1093_v29 = vpack.c.bf16 %v546_v27, %v545_v26 }
  0xb7   :  { %v267_v30 = vpop.f32.mrf.mxu3 }
  0xb8   :  { %v476_v31 = vpop.f32.mrf.mxu1  ;;  %v524_v14 = vadd.f32 %v523_v28, %v267_v30 }
  0xb9   :  { %v220_v32 = vpop.f32.mrf.mxu0 }
  0xba   :  { %v477_v33 = vadd.f32 %v476_v31, %v220_v32  ;;  %v566_v21 = vmax.f32 %v524_v14, 0.0  ;;  %v893_v14 = vld [vmem:[%s1160_s4 + $0x14] sm:$0xf] }
  0xbc   :  { %v547_v39 = vmax.f32 %v477_v33, 0.0  ;;  %v589_v25 = vpack.c.bf16 %v566_v21, %v565_v20 }
  0xbe   :  { %v526_v34 = vpop.f32.mrf.mxu2 }
  0xbf   :  { %v270_v35 = vpop.f32.mrf.mxu3 }
  0xc0   :  { %v478_v36 = vpop.f32.mrf.mxu1  ;;  %v527_v9 = vadd.f32 %v526_v34, %v270_v35 }
  0xc1   :  { %v222_v37 = vpop.f32.mrf.mxu0 }
  0xc2   :  { %v479_v38 = vadd.f32 %v478_v36, %v222_v37  ;;  %v567_v15 = vmax.f32 %v527_v9, 0.0 }
  0xc4   :  { %v548_v40 = vmax.f32 %v479_v38, 0.0 }
  0xc6   :  { %v528_v41 = vpop.f32.mrf.mxu2  ;;  %v1095_v42 = vpack.c.bf16 %v548_v40, %v547_v39 }
  0xc7   :  { %v272_v43 = vpop.f32.mrf.mxu3 }
  0xc8   :  { %v481_v44 = vpop.f32.mrf.mxu1  ;;  %v529_v10 = vadd.f32 %v528_v41, %v272_v43 }
  0xc9   :  { %v225_v45 = vpop.f32.mrf.mxu0 }
  0xca   :  { %v1097_v46 = vadd.f32 %v481_v44, %v225_v45  ;;  %v568_v16 = vmax.f32 %v529_v10, 0.0  ;;  %v853_v10 = vld [vmem:[%s1160_s4 + $0x10] sm:$0xf] }
  0xcc   :  { %v590_v23 = vpack.c.bf16 %v568_v16, %v567_v15  ;;  %v855_v15 = vld [vmem:[%s1160_s4 + $0x18] sm:$0xf0] }
  0xcd   :  { %v858_v16 = vor.u32 %v893_v14, %v855_v15 }
  0xce   :  { %v531_v47 = vpop.f32.mrf.mxu2 }
  0xcf   :  { %v275_v48 = vpop.f32.mrf.mxu3 }
  0xd0   :  { %v483_v49 = vpop.f32.mrf.mxu1  ;;  %v532_v61 = vadd.f32 %v531_v47, %v275_v48 }
  0xd1   :  { %v227_v50 = vpop.f32.mrf.mxu0 }
  0xd2   :  { %v569_v6 = vmax.f32 %v532_v61, 0.0  ;;  %v484_v43 = vadd.f32 %v483_v49, %v227_v50  ;;  %v593_v49 = vld [vmem:[%s1159_s5] sm:$0xff] }
  0xd4   :  { %v550_v47 = vmax.f32 %v484_v43, 0.0 }
  0xd6   :  { %v533_v51 = vpop.f32.mrf.mxu2 }
  0xd7   :  { %v277_v52 = vpop.f32.mrf.mxu3 }
  0xd8   :  { %v486_v53 = vpop.f32.mrf.mxu1  ;;  %v534_v62 = vadd.f32 %v533_v51, %v277_v52  ;;  %v904_v52 = vmov 0  }
  0xd9   :  { %v230_v54 = vpop.f32.mrf.mxu0  ;;  %900 = vset.pattern.permute.xlu0 %v904_v52  ;;  %901 = vset.pattern.permute.xlu1 %v904_v52 }
  0xda   :  { %v570_v7 = vmax.f32 %v534_v62, 0.0  ;;  %v487_v38 = vadd.f32 %v486_v53, %v230_v54  ;;  %599 = vperm.xlu0 %900, %v593_v49  }
  0xdc   :  { %v591_v13 = vpack.c.bf16 %v570_v7, %v569_v6  ;;  %v551_v45 = vmax.f32 %v487_v38, 0.0  ;;  %v891_v7 = vld [vmem:[%s1160_s4 + $0x4] sm:$0xf] }
  0xde   :  { %v536_v56 = vpop.f32.mrf.mxu2 }
  0xdf   :  { %v280_v57 = vpop.f32.mrf.mxu3 }
  0xe0   :  { %v488_v58 = vpop.f32.mrf.mxu1  ;;  %v537_v60 = vadd.f32 %v536_v56, %v280_v57  ;;  %v595_v57 = vld [vmem:[%s1159_s5 + $0x10] sm:$0xff] }
  0xe1   :  { %v232_v59 = vpop.f32.mrf.mxu0  ;;  %609 = vperm.xlu1 %901, %v595_v57  }
  0xe2   :  { %v571_v2 = vmax.f32 %v537_v60, 0.0  ;;  %v489_v22 = vadd.f32 %v488_v58, %v232_v59 }
  0xe6   :  { %v538_v63 = vpop.f32.mrf.mxu2 }
  0xe7   :  { %v282_v0 = vpop.f32.mrf.mxu3 }
  0xe8   :  { %v539_v3 = vadd.f32 %v538_v63, %v282_v0  ;;  %v491_v4 = vpop.f32.mrf.mxu1 }
  0xe9   :  { %v235_v5 = vpop.f32.mrf.mxu0 }
  0xea   :  { %v572_v8 = vmax.f32 %v539_v3, 0.0  ;;  %v492_v33 = vadd.f32 %v491_v4, %v235_v5  ;;  %v596_v5 = vld [vmem:[%s1159_s5 + $0x18] sm:$0xff] }
  0xeb   :  { %614 = vperm.xlu1 %901, %v596_v5  }
  0xec   :  { %v592_v12 = vpack.c.bf16 %v572_v8, %v571_v2  ;;  %v553_v39 = vmax.f32 %v492_v33, 0.0  ;;  %v847_v8 = vld [vmem:[%s1160_s4 + $0x8] sm:$0xf0] }
  0xed   :  { %v850_v9 = vor.u32 %v891_v7, %v847_v8 }
  0xee   :  { %656 = vmatpush.bf16.msrb.mxu3 %v592_v12  ;;  %v894_v12 = vld [vmem:[%s1160_s4 + $0x14] sm:$0xf0] }
  0xf0   :  { %v493_v17 = vpop.f32.mrf.mxu1 }
  0xf1   :  { %v237_v18 = vpop.f32.mrf.mxu0 }
  0xf2   :  { %657 = vmatpush.bf16.msrb.mxu3 %v591_v13  ;;  %v494_v28 = vadd.f32 %v493_v17, %v237_v18  ;;  %v854_v13 = vor.u32 %v894_v12, %v853_v10 }
  0xf4   :  { %v554_v36 = vmax.f32 %v494_v28, 0.0 }
  0xf6   :  { %658 = vmatpush.bf16.msrb.mxu3 %v590_v23  ;;  %v583_v44 = vpack.c.bf16 %v554_v36, %v553_v39 }
  0xf8   :  { %v496_v24 = vpop.f32.mrf.mxu1 }
  0xf9   :  { %v240_v26 = vpop.f32.mrf.mxu0 }
  0xfa   :  { %659 = vmatpush.bf16.msrb.mxu3 %v589_v25  ;;  %v497_v27 = vadd.f32 %v496_v24, %v240_v26 }
  0xfc   :  { %v555_v34 = vmax.f32 %v497_v27, 0.0 }
  0xfe   :  { %660 = vmatpush.bf16.msrb.mxu3 %v1089_v19  ;;  %v552_v19 = vmax.f32 %v489_v22, 0.0 }
 0x100   :  { %v498_v31 = vpop.f32.mrf.mxu1  ;;  %v582_v48 = vpack.c.bf16 %v552_v19, %v551_v45 }
 0x101   :  { %v242_v32 = vpop.f32.mrf.mxu0 }
 0x102   :  { %v499_v30 = vadd.f32 %v498_v31, %v242_v32  ;;  %661 = vmatpush.bf16.msrb.mxu3 %v1085_v1  ;;  %v549_v1 = vmax.f32 %v1097_v46, 0.0  ;;  %v594_v46 = vld [vmem:[%s1159_s5 + $0x8] sm:$0xff] }
 0x103   :  { %604 = vperm.xlu0 %900, %v594_v46  }
 0x104   :  { %v556_v35 = vmax.f32 %v499_v30, 0.0  ;;  %v581_v53 = vpack.c.bf16 %v550_v47, %v549_v1 }
 0x106   :  { %v584_v37 = vpack.c.bf16 %v556_v35, %v555_v34 }
 0x108   :  { %637 = vmatpush.bf16.msrb.mxu2 %v584_v37  ;;  %v501_v40 = vpop.f32.mrf.mxu1 }
 0x109   :  { %v245_v41 = vpop.f32.mrf.mxu0 }
 0x10a   :  { %v502_v0 = vadd.f32 %v501_v40, %v245_v41 }
 0x10c   :  { %638 = vmatpush.bf16.msrb.mxu2 %v583_v44  ;;  %v557_v6 = vmax.f32 %v502_v0, 0.0 }
 0x110   :  { %639 = vmatpush.bf16.msrb.mxu2 %v582_v48  ;;  %v503_v51 = vpop.f32.mrf.mxu1 }
 0x111   :  { %v247_v56 = vpop.f32.mrf.mxu0 }
 0x112   :  { %v504_v61 = vadd.f32 %v503_v51, %v247_v56 }
 0x114   :  { %640 = vmatpush.bf16.msrb.mxu2 %v581_v53  ;;  %v558_v3 = vmax.f32 %v504_v61, 0.0 }
 0x118   :  { %641 = vmatpush.bf16.msrb.mxu2 %v1095_v42  ;;  %v506_v50 = vpop.f32.mrf.mxu1  ;;  %v845_v42 = vld [vmem:[%s1160_s4] sm:$0xf] }
 0x119   :  { %v250_v54 = vpop.f32.mrf.mxu0 }
 0x11a   :  { %v507_v58 = vadd.f32 %v506_v50, %v250_v54 }
 0x11c   :  { %642 = vmatpush.bf16.msrb.mxu2 %v1093_v29  ;;  %v892_v29 = vld [vmem:[%s1160_s4 + $0x4] sm:$0xf0] }
 0x11d   :  { %v846_v63 = vor.u32 %v892_v29, %v845_v42 }
 0x120   :  { %643 = vmatpush.bf16.msrb.mxu2 %v1087_v11  ;;  %v508_v59 = vpop.f32.mrf.mxu1  ;;  %v559_v11 = vmax.f32 %v507_v58, 0.0 }
 0x121   :  { %v252_v60 = vpop.f32.mrf.mxu0 }
 0x122   :  { %v509_v62 = vadd.f32 %v508_v59, %v252_v60 }
 0x124   :  { %644 = vmatpush.bf16.msrb.mxu2 %v1075_v55  ;;  %v560_v2 = vmax.f32 %v509_v62, 0.0  ;;  %v585_v55 = vpack.c.bf16 %v558_v3, %v557_v6 }
 0x126   :  { %v586_v4 = vpack.c.bf16 %v560_v2, %v559_v11 }
 0x127   :  { %645 = vmatmul.bf16.vlgmr.msrb.gmra.mxu2 %v846_v63 }
 0x128   :  { %662 = vmatpush.bf16.msrb.mxu3 %v586_v4 }
 0x12c   :  { %663 = vmatpush.bf16.msrb.mxu3 %v585_v55 }
 0x12f   :  { %664 = vmatmul.bf16.vlgmr.msrb.gmra.mxu3 %v850_v9 }
 0x137   :  { %650 = vmatmul.bf16.gmra.mxu2 %v854_v13 }
 0x13f   :  { %669 = vmatmul.bf16.gmra.mxu3 %v858_v16 }
 0x14c   :  { %v600_v18 = vpop.permute.xlu0 %599 }
 0x153   :  { %v610_v28 = vpop.permute.xlu1 %609 }
 0x15d   :  { %v615_v22 = vpop.permute.xlu1 %614 }
 0x175   :  { %v605_v25 = vpop.permute.xlu0 %604 }
 0x1aa   :  { %v646_v17 = vpop.f32.mrf.mxu2 }
 0x1ab   :  { %v647_v20 = vadd.f32 %v646_v17, %v600_v18 }
 0x1b2   :  { %v665_v21 = vpop.f32.mrf.mxu3  ;;  %v648_v23 = vpop.f32.mrf.mxu2 }
 0x1b3   :  { %v666_v24 = vadd.f32 %v665_v21, %v647_v20  ;;  %v649_v26 = vadd.f32 %v648_v23, %v605_v25 }
 0x1b5   :  { %675 = vst [vmem:[%s1161_s6] sm:$0xff] %v666_v24 }
 0x1ba   :  { %v667_v27 = vpop.f32.mrf.mxu3  ;;  %v651_v32 = vpop.f32.mrf.mxu2 }
 0x1bb   :  { %v668_v31 = vadd.f32 %v667_v27, %v649_v26  ;;  %v652_v30 = vadd.f32 %v651_v32, %v610_v28 }
 0x1bd   :  { %676 = vst [vmem:[%s1161_s6 + $0x8] sm:$0xff] %v668_v31 }
 0x1c2   :  { %v670_v33 = vpop.f32.mrf.mxu3  ;;  %v653_v35 = vpop.f32.mrf.mxu2 }
 0x1c3   :  { %v671_v34 = vadd.f32 %v670_v33, %v652_v30  ;;  %v654_v36 = vadd.f32 %v653_v35, %v615_v22 }
 0x1c5   :  { %677 = vst [vmem:[%s1161_s6 + $0x10] sm:$0xff] %v671_v34 }
 0x1ca   :  { %v672_v37 = vpop.f32.mrf.mxu3 }
 0x1cb   :  { %v673_v38 = vadd.f32 %v672_v37, %v654_v36 }
 0x1cd   :  { %678 = vst [vmem:[%s1161_s6 + $0x18] sm:$0xff] %v673_v38 }

</bundles_post_ra>
